<compile_context>
chip_gen: v7x
topology: tpu7x:2x2x1
jax: 0.10.0
libtpu: 0.0.40
codegen_flags: <defaults>
</compile_context>

<pallas_src>
import functools

import jax
import jax.numpy as jnp
from jax.experimental import pallas as pl
from jax.experimental.pallas import tpu as pltpu


def _round_up(a, b):
    return ((a + b - 1) // b) * b


def _vmem_capacity_bytes():
    """Per-core VMEM capacity; conservative 64 MiB (v7x) fallback."""
    try:
        return int(pltpu.get_tpu_info().vmem_capacity_bytes)
    except Exception:
        return 64 * 1024 * 1024


def fc_layer_kernel(x_ref, w1_ref, b1_ref, w2_ref, b2_ref, g_ref, beta_ref,
                    o_ref, *, h_real, h_padded):
    k = pl.program_id(1)

    @pl.when(k == 0)
    def _():
        # Fold the second-layer bias into the accumulator init; the f32 output block is
        # the accumulator (resident across the k axis via its index_map).
        o_ref[...] = jnp.broadcast_to(b2_ref[...], o_ref.shape)

    # hidden chunk: relu(x @ W1[:, k-chunk] + b1[k-chunk])  (bf16 operands, f32 acc)
    h = jnp.dot(x_ref[...], w1_ref[...], preferred_element_type=jnp.float32)
    h = jnp.maximum(h + b1_ref[...], 0.0)                        # (TM, tile_k) f32

    # second matmul, accumulated over the 2H chunks directly into the output block
    o_ref[...] += jnp.dot(h.astype(jnp.bfloat16), w2_ref[...],
                          preferred_element_type=jnp.float32)    # (TM, H_pad) f32

    @pl.when(k == pl.num_programs(1) - 1)
    def _():
        y = o_ref[...]                                           # (TM, H_pad) f32
        inv_h = jnp.float32(1.0 / h_real)
        if h_padded:
            lane = jax.lax.broadcasted_iota(jnp.int32, y.shape, 1)
            mask = lane < h_real
            y = jnp.where(mask, y, 0.0)
        mean = jnp.sum(y, axis=-1, keepdims=True) * inv_h
        cent = y - mean
        if h_padded:
            cent = jnp.where(mask, cent, 0.0)
        var = jnp.sum(cent * cent, axis=-1, keepdims=True) * inv_h
        yn = cent * jax.lax.rsqrt(var + 1e-5) * g_ref[...] + beta_ref[...]
        # residual add (dropout is identity in eval mode); x kept resident across k.
        o_ref[...] = x_ref[...].astype(jnp.float32) + yn


def fc_layer(x, w1, b1, w2, b2, gamma, beta, *, tile_m=512, tile_k=256):
    """x: (N, H). w1: (H, 2H), b1: (1, 2H), w2: (2H, H), b2/gamma/beta: (1, H)."""
    N, H = x.shape
    H2 = w1.shape[1]

    H_pad = _round_up(H, 128)
    H2_full = _round_up(H2, 128)

    budget = int(_vmem_capacity_bytes() * 0.85)

    # Row tiling: adaptive; guarantee >= 2 row tiles when N allows (v7x megacore).
    tile_m = max(8, min(tile_m, _round_up(N, 8)))
    if _round_up(N, tile_m) == tile_m and N >= 16:
        tile_m = _round_up((N + 1) // 2, 8)

    def vmem_est(tm, tk):
        return (2 * tm * H_pad * 2            # x (bf16, double-buffered)
                + 2 * H_pad * tk * 2          # W1 chunk (bf16)
                + 2 * tk * H_pad * 2          # W2 chunk (bf16)
                + 2 * 8 * tk * 4              # b1 chunk (f32, sublane-padded)
                + 2 * 3 * 8 * H_pad * 4       # b2 / gamma / beta (sublane-padded)
                + 2 * tm * H_pad * 4          # output block == f32 accumulator
                + tm * tk * 6)                # h temporary (f32 + bf16 copy)

    # Contraction tiling: keep W1/W2 fully VMEM-resident (single k step, DMA'd once)
    # whenever the footprint fits the per-core budget; otherwise chunk the 2H axis.
    if vmem_est(tile_m, H2_full) <= budget:
        tile_k = H2_full
    else:
        tile_k = max(128, min(_round_up(tile_k, 128), H2_full))

    # Auto-shrink tiles until the footprint fits the per-core VMEM budget.
    while vmem_est(tile_m, tile_k) > budget and (tile_m > 8 or tile_k > 128):
        if tile_m > 8:
            tile_m = max(8, _round_up(tile_m // 2, 8))
        else:
            tile_k = max(128, _round_up(tile_k // 2, 128))

    N_pad = _round_up(N, tile_m)
    H2_pad = _round_up(H2, tile_k)

    f32, bf16 = jnp.float32, jnp.bfloat16
    x_p = jnp.pad(x, ((0, N_pad - N), (0, H_pad - H))).astype(bf16)
    w1_p = jnp.pad(w1, ((0, H_pad - H), (0, H2_pad - H2))).astype(bf16)
    b1_p = jnp.pad(b1, ((0, 0), (0, H2_pad - H2))).astype(f32)
    w2_p = jnp.pad(w2, ((0, H2_pad - H2), (0, H_pad - H))).astype(bf16)
    b2_p = jnp.pad(b2, ((0, 0), (0, H_pad - H))).astype(f32)
    g_p = jnp.pad(gamma, ((0, 0), (0, H_pad - H))).astype(f32)
    beta_p = jnp.pad(beta, ((0, 0), (0, H_pad - H))).astype(f32)

    grid = (N_pad // tile_m, H2_pad // tile_k)

    vmem_limit = int(min(max(int(vmem_est(tile_m, tile_k) * 1.3),
                             16 * 1024 * 1024), budget))

    # Weights are only re-streamed per row tile when the 2H axis is actually chunked.
    weight_passes = grid[0] if grid[1] > 1 else 1
    cost = pl.CostEstimate(
        flops=4 * N_pad * H_pad * H2_pad,                 # two matmuls
        transcendentals=N_pad,                            # one rsqrt per row
        bytes_accessed=(x_p.size * 2                      # x read (bf16)
                        + N_pad * H_pad * 4               # output write (f32)
                        + weight_passes * (w1_p.size + w2_p.size) * 2
                        + (b1_p.size + b2_p.size + g_p.size + beta_p.size) * 4),
    )

    out = pl.pallas_call(
        functools.partial(fc_layer_kernel, h_real=H, h_padded=(H != H_pad)),
        out_shape=jax.ShapeDtypeStruct((N_pad, H_pad), jnp.float32),
        grid_spec=pltpu.PrefetchScalarGridSpec(
            num_scalar_prefetch=0,
            grid=grid,
            in_specs=[
                pl.BlockSpec((tile_m, H_pad), lambda i, k: (i, 0)),   # x rows (resident over k)
                pl.BlockSpec((H_pad, tile_k), lambda i, k: (0, k)),   # W1 chunk
                pl.BlockSpec((1, tile_k), lambda i, k: (0, k)),       # b1 chunk
                pl.BlockSpec((tile_k, H_pad), lambda i, k: (k, 0)),   # W2 chunk
                pl.BlockSpec((1, H_pad), lambda i, k: (0, 0)),        # b2
                pl.BlockSpec((1, H_pad), lambda i, k: (0, 0)),        # gamma
                pl.BlockSpec((1, H_pad), lambda i, k: (0, 0)),        # beta
            ],
            out_specs=pl.BlockSpec((tile_m, H_pad), lambda i, k: (i, 0)),
        ),
        compiler_params=pltpu.CompilerParams(
            dimension_semantics=("parallel", "arbitrary"),
            vmem_limit_bytes=vmem_limit,
        ),
        cost_estimate=cost,
    )(x_p, w1_p, b1_p, w2_p, b2_p, g_p, beta_p)

    return out[:N, :H].astype(x.dtype)


def init_params(key, hidden_size):
    """Deterministic init matching nn.Linear / nn.LayerNorm shapes."""
    h, h2 = hidden_size, hidden_size * 2
    k1, k2, k3, k4 = jax.random.split(key, 4)
    lim1 = 1.0 / jnp.sqrt(h)
    lim2 = 1.0 / jnp.sqrt(h2)
    w1 = jax.random.uniform(k1, (h, h2), jnp.float32, -lim1, lim1)
    b1 = jax.random.uniform(k2, (1, h2), jnp.float32, -lim1, lim1)
    w2 = jax.random.uniform(k3, (h2, h), jnp.float32, -lim2, lim2)
    b2 = jax.random.uniform(k4, (1, h), jnp.float32, -lim2, lim2)
    gamma = jnp.ones((1, h), jnp.float32)
    beta = jnp.zeros((1, h), jnp.float32)
    return w1, b1, w2, b2, gamma, beta


if __name__ == "__main__":
    batch, seq, hidden = 2, 8, 32
    key = jax.random.PRNGKey(0)
    kx, kp = jax.random.split(key)

    x = jax.random.normal(kx, (batch, seq, hidden), jnp.float32)
    w1, b1, w2, b2, gamma, beta = init_params(kp, hidden)

    # flatten leading dims to rows (layout: (N, H))
    x2d = x.reshape(batch * seq, hidden)
    out2d = fc_layer(x2d, w1, b1, w2, b2, gamma, beta)
    out = out2d.reshape(batch, seq, hidden)
    jax.block_until_ready(out)

    # pure-JAX reference (bf16-operand / f32-accumulation matmuls; f32 residual --
    # the kernel's residual uses bf16-x, accepted within the tolerance below).
    xb = x2d.astype(jnp.bfloat16)
    h_ref = jnp.maximum(
        jnp.dot(xb, w1.astype(jnp.bfloat16), preferred_element_type=jnp.float32) + b1,
        0.0)
    y_ref = jnp.dot(h_ref.astype(jnp.bfloat16), w2.astype(jnp.bfloat16),
                    preferred_element_type=jnp.float32) + b2
    mu = jnp.mean(y_ref, axis=-1, keepdims=True)
    var = jnp.mean((y_ref - mu) ** 2, axis=-1, keepdims=True)
    y_ref = (y_ref - mu) * jax.lax.rsqrt(var + 1e-5) * gamma + beta
    ref = (x2d + y_ref).reshape(batch, seq, hidden)
    assert jnp.allclose(out, ref, atol=2e-2, rtol=2e-2), "mismatch vs reference"

    print("KERNEL_OK")
</pallas_src>

<mosaic_0001>
module attributes {stable_mosaic.version = 11 : i64} {
  func.func @fc_layer_kernel(%arg0: i32, %arg1: i32, %arg2: memref<8x128xbf16, #tpu.memory_space<vmem>>, %arg3: memref<128x128xbf16, #tpu.memory_space<vmem>>, %arg4: memref<1x128xf32, #tpu.memory_space<vmem>>, %arg5: memref<128x128xbf16, #tpu.memory_space<vmem>>, %arg6: memref<1x128xf32, #tpu.memory_space<vmem>>, %arg7: memref<1x128xf32, #tpu.memory_space<vmem>>, %arg8: memref<1x128xf32, #tpu.memory_space<vmem>>, %arg9: memref<8x128xf32, #tpu.memory_space<vmem>>) attributes {dimension_semantics = [#tpu.dimension_semantics<parallel>, #tpu.dimension_semantics<arbitrary>], iteration_bounds = array<i64: 2, 1>, scalar_prefetch = 0 : i64, scratch_operands = 0 : i64, tpu.core_type = #tpu.core_type<tc>, window_params = [{transform_indices = @transform_0, window_bounds = array<i64: 8, 128>}, {transform_indices = @transform_1, window_bounds = array<i64: 128, 128>}, {transform_indices = @transform_2, window_bounds = array<i64: 1, 128>}, {transform_indices = @transform_3, window_bounds = array<i64: 128, 128>}, {pipeline_mode = #tpu.pipeline_mode<synchronous>, transform_indices = @transform_4, window_bounds = array<i64: 1, 128>}, {pipeline_mode = #tpu.pipeline_mode<synchronous>, transform_indices = @transform_5, window_bounds = array<i64: 1, 128>}, {pipeline_mode = #tpu.pipeline_mode<synchronous>, transform_indices = @transform_6, window_bounds = array<i64: 1, 128>}, {transform_indices = @transform_7, window_bounds = array<i64: 8, 128>}]} {
    %c0_i32 = arith.constant 0 : i32
    %0 = arith.cmpi eq, %arg1, %c0_i32 : i32
    %1 = arith.extui %0 : i1 to i32
    %c0_i32_0 = arith.constant 0 : i32
    %2 = arith.cmpi ne, %1, %c0_i32_0 : i32
    scf.if %2 {
      %c0_16 = arith.constant 0 : index
      %c0_17 = arith.constant 0 : index
      %20 = vector.load %arg6[%c0_16, %c0_17] : memref<1x128xf32, #tpu.memory_space<vmem>>, vector<1x128xf32>
      %21 = vector.shape_cast %20 : vector<1x128xf32> to vector<1x128xf32>
      %22 = vector.broadcast %21 : vector<1x128xf32> to vector<8x128xf32>
      %c0_18 = arith.constant 0 : index
      %c0_19 = arith.constant 0 : index
      %23 = vector.load %arg9[%c0_18, %c0_19] : memref<8x128xf32, #tpu.memory_space<vmem>>, vector<8x128xf32>
      tpu.vector_store %arg9[%c0_18, %c0_19], %22 {strides = array<i32>} : memref<8x128xf32, #tpu.memory_space<vmem>>, vector<8x128xf32>,
    } else {
    }
    %c0 = arith.constant 0 : index
    %c0_1 = arith.constant 0 : index
    %3 = vector.load %arg2[%c0, %c0_1] : memref<8x128xbf16, #tpu.memory_space<vmem>>, vector<8x128xbf16>
    %c0_2 = arith.constant 0 : index
    %c0_3 = arith.constant 0 : index
    %4 = vector.load %arg3[%c0_2, %c0_3] : memref<128x128xbf16, #tpu.memory_space<vmem>>, vector<128x128xbf16>
    %cst = arith.constant dense<0.000000e+00> : vector<8x128xf32>
    %5 = tpu.matmul %3, %4, %cst {dimension_numbers = #tpu.dot_dimension_numbers<[1], [0], [0], [1], [0, 0, 1, 1], [], []>} : vector<8x128xbf16>, vector<128x128xbf16>, vector<8x128xf32> -> vector<8x128xf32>
    %c0_4 = arith.constant 0 : index
    %c0_5 = arith.constant 0 : index
    %6 = vector.load %arg4[%c0_4, %c0_5] : memref<1x128xf32, #tpu.memory_space<vmem>>, vector<1x128xf32>
    %7 = vector.broadcast %6 : vector<1x128xf32> to vector<8x128xf32>
    %8 = arith.addf %5, %7 : vector<8x128xf32>
    %cst_6 = arith.constant 0.000000e+00 : f32
    %9 = vector.broadcast %cst_6 : f32 to vector<8x128xf32>
    %10 = arith.maximumf %8, %9 : vector<8x128xf32>
    %c0_7 = arith.constant 0 : index
    %c0_8 = arith.constant 0 : index
    %11 = vector.load %arg9[%c0_7, %c0_8] : memref<8x128xf32, #tpu.memory_space<vmem>>, vector<8x128xf32>
    %12 = arith.truncf %10 : vector<8x128xf32> to vector<8x128xbf16>
    %c0_9 = arith.constant 0 : index
    %c0_10 = arith.constant 0 : index
    %13 = vector.load %arg5[%c0_9, %c0_10] : memref<128x128xbf16, #tpu.memory_space<vmem>>, vector<128x128xbf16>
    %cst_11 = arith.constant dense<0.000000e+00> : vector<8x128xf32>
    %14 = tpu.matmul %12, %13, %cst_11 {dimension_numbers = #tpu.dot_dimension_numbers<[1], [0], [0], [1], [0, 0, 1, 1], [], []>} : vector<8x128xbf16>, vector<128x128xbf16>, vector<8x128xf32> -> vector<8x128xf32>
    %15 = arith.addf %11, %14 : vector<8x128xf32>
    %c0_12 = arith.constant 0 : index
    %c0_13 = arith.constant 0 : index
    %16 = vector.load %arg9[%c0_12, %c0_13] : memref<8x128xf32, #tpu.memory_space<vmem>>, vector<8x128xf32>
    tpu.vector_store %arg9[%c0_12, %c0_13], %15 {strides = array<i32>} : memref<8x128xf32, #tpu.memory_space<vmem>>, vector<8x128xf32>,
    %c0_i32_14 = arith.constant 0 : i32
    %17 = arith.cmpi eq, %arg1, %c0_i32_14 : i32
    %18 = arith.extui %17 : i1 to i32
    %c0_i32_15 = arith.constant 0 : i32
    %19 = arith.cmpi ne, %18, %c0_i32_15 : i32
    scf.if %19 {
      %c0_16 = arith.constant 0 : index
      %c0_17 = arith.constant 0 : index
      %20 = vector.load %arg9[%c0_16, %c0_17] : memref<8x128xf32, #tpu.memory_space<vmem>>, vector<8x128xf32>
      %21 = tpu.iota {dimensions = array<i32: 1>} : vector<8x128xi32>
      %c32_i32 = arith.constant 32 : i32
      %22 = vector.broadcast %c32_i32 : i32 to vector<8x128xi32>
      %23 = arith.cmpi slt, %21, %22 : vector<8x128xi32>
      %cst_18 = arith.constant 0.000000e+00 : f32
      %24 = vector.broadcast %cst_18 : f32 to vector<8x128xf32>
      %25 = arith.select %23, %20, %24 : vector<8x128xi1>, vector<8x128xf32>
      %cst_19 = arith.constant dense<0.000000e+00> : vector<8xf32>
      %26 = vector.multi_reduction <add>, %25, %cst_19 [1] : vector<8x128xf32> to vector<8xf32>
      %27 = vector.shape_cast %26 : vector<8xf32> to vector<8x1xf32>
      %cst_20 = arith.constant 3.125000e-02 : f32
      %28 = vector.broadcast %cst_20 : f32 to vector<8x1xf32>
      %29 = arith.mulf %27, %28 : vector<8x1xf32>
      %30 = vector.broadcast %29 : vector<8x1xf32> to vector<8x128xf32>
      %31 = arith.subf %25, %30 : vector<8x128xf32>
      %cst_21 = arith.constant 0.000000e+00 : f32
      %32 = vector.broadcast %cst_21 : f32 to vector<8x128xf32>
      %33 = arith.select %23, %31, %32 : vector<8x128xi1>, vector<8x128xf32>
      %34 = arith.mulf %33, %33 : vector<8x128xf32>
      %cst_22 = arith.constant dense<0.000000e+00> : vector<8xf32>
      %35 = vector.multi_reduction <add>, %34, %cst_22 [1] : vector<8x128xf32> to vector<8xf32>
      %36 = vector.shape_cast %35 : vector<8xf32> to vector<8x1xf32>
      %cst_23 = arith.constant 3.125000e-02 : f32
      %37 = vector.broadcast %cst_23 : f32 to vector<8x1xf32>
      %38 = arith.mulf %36, %37 : vector<8x1xf32>
      %cst_24 = arith.constant 9.99999974E-6 : f32
      %39 = vector.broadcast %cst_24 : f32 to vector<8x1xf32>
      %40 = arith.addf %38, %39 : vector<8x1xf32>
      %41 = math.rsqrt %40 : vector<8x1xf32>
      %42 = vector.broadcast %41 : vector<8x1xf32> to vector<8x128xf32>
      %43 = arith.mulf %33, %42 : vector<8x128xf32>
      %c0_25 = arith.constant 0 : index
      %c0_26 = arith.constant 0 : index
      %44 = vector.load %arg7[%c0_25, %c0_26] : memref<1x128xf32, #tpu.memory_space<vmem>>, vector<1x128xf32>
      %45 = vector.broadcast %44 : vector<1x128xf32> to vector<8x128xf32>
      %46 = arith.mulf %43, %45 : vector<8x128xf32>
      %c0_27 = arith.constant 0 : index
      %c0_28 = arith.constant 0 : index
      %47 = vector.load %arg8[%c0_27, %c0_28] : memref<1x128xf32, #tpu.memory_space<vmem>>, vector<1x128xf32>
      %48 = vector.broadcast %47 : vector<1x128xf32> to vector<8x128xf32>
      %49 = arith.addf %46, %48 : vector<8x128xf32>
      %c0_29 = arith.constant 0 : index
      %c0_30 = arith.constant 0 : index
      %50 = vector.load %arg2[%c0_29, %c0_30] : memref<8x128xbf16, #tpu.memory_space<vmem>>, vector<8x128xbf16>
      %51 = arith.extf %50 : vector<8x128xbf16> to vector<8x128xf32>
      %52 = arith.addf %51, %49 : vector<8x128xf32>
      %c0_31 = arith.constant 0 : index
      %c0_32 = arith.constant 0 : index
      %53 = vector.load %arg9[%c0_31, %c0_32] : memref<8x128xf32, #tpu.memory_space<vmem>>, vector<8x128xf32>
      tpu.vector_store %arg9[%c0_31, %c0_32], %52 {strides = array<i32>} : memref<8x128xf32, #tpu.memory_space<vmem>>, vector<8x128xf32>,
    } else {
    }
    return
  }
  func.func @transform_0(%arg0: i32, %arg1: i32) -> (i32, i32) {
    %c0_i32 = arith.constant 0 : i32
    %c0_i32_0 = arith.constant 0 : i32
    return %arg0, %c0_i32 : i32, i32
  }
  func.func @transform_1(%arg0: i32, %arg1: i32) -> (i32, i32) {
    %c0_i32 = arith.constant 0 : i32
    %c0_i32_0 = arith.constant 0 : i32
    return %c0_i32, %arg1 : i32, i32
  }
  func.func @transform_2(%arg0: i32, %arg1: i32) -> (i32, i32) {
    %c0_i32 = arith.constant 0 : i32
    %c0_i32_0 = arith.constant 0 : i32
    return %c0_i32, %arg1 : i32, i32
  }
  func.func @transform_3(%arg0: i32, %arg1: i32) -> (i32, i32) {
    %c0_i32 = arith.constant 0 : i32
    %c0_i32_0 = arith.constant 0 : i32
    return %arg1, %c0_i32 : i32, i32
  }
  func.func @transform_4(%arg0: i32, %arg1: i32) -> (i32, i32) {
    %c0_i32 = arith.constant 0 : i32
    %c0_i32_0 = arith.constant 0 : i32
    %c0_i32_1 = arith.constant 0 : i32
    return %c0_i32, %c0_i32_0 : i32, i32
  }
  func.func @transform_5(%arg0: i32, %arg1: i32) -> (i32, i32) {
    %c0_i32 = arith.constant 0 : i32
    %c0_i32_0 = arith.constant 0 : i32
    %c0_i32_1 = arith.constant 0 : i32
    return %c0_i32, %c0_i32_0 : i32, i32
  }
  func.func @transform_6(%arg0: i32, %arg1: i32) -> (i32, i32) {
    %c0_i32 = arith.constant 0 : i32
    %c0_i32_0 = arith.constant 0 : i32
    %c0_i32_1 = arith.constant 0 : i32
    return %c0_i32, %c0_i32_0 : i32, i32
  }
  func.func @transform_7(%arg0: i32, %arg1: i32) -> (i32, i32) {
    %c0_i32 = arith.constant 0 : i32
    %c0_i32_0 = arith.constant 0 : i32
    return %arg0, %c0_i32 : i32, i32
  }
}

</mosaic_0001>

<bundles_post_ra>
// kernel: tpu_custom_call.1
= control target key start
LH: loop header
LB: loop body
LE: loop exit
PB: predicated region body
PF: predicated region fallthrough
CT: control target
= control target key end

     0   :  { %12 = vsyncpa [#allocation3], 0  ;;  %s1456_s0 = inlined_call_operand.hbm [shape: bf16[16,128], index: 0, kind: input, shape index: {}]   ;;  %s1457_s1 = inlined_call_operand.hbm [shape: bf16[128,128], index: 1, kind: input, shape index: {}]   ;;  %s1458_s2 = inlined_call_operand.vmem [shape: f32[1,128], index: 2, kind: input, shape index: {}]   ;;  %s1459_s3 = inlined_call_operand.hbm [shape: bf16[128,128], index: 3, kind: input, shape index: {}]   ;;  %s1460_s4 = inlined_call_operand.vmem [shape: f32[1,128], index: 4, kind: input, shape index: {}]   ;;  %s1461_s5 = inlined_call_operand.vmem [shape: f32[1,128], index: 5, kind: input, shape index: {}]   ;;  %s1462_s6 = inlined_call_operand.vmem [shape: f32[1,128], index: 6, kind: input, shape index: {}]   ;;  %s1463_s7 = inlined_call_operand.hbm [shape: f32[16,128], index: 7, kind: output, shape index: {}]  }
   0x1   :  { %14 = vsyncpa [#allocation3 + $0x1], 0 }
   0x2   :  { %15 = vsyncpa [#allocation6], 0 }
   0x3   :  { %16 = vsyncpa [#allocation4], 0 }
   0x4   :  { %18 = vsyncpa [#allocation4 + $0x1], 0  ;;  %s1189_s24 = smov 0   ;;  %s1191_s25 = smov 0  }
   0x5   :  { %s1193_s26 = smov 0   ;;  %s1195_s27 = smov 0  }
   0x6   :  { %s1197_s28 = smov 0   ;;  %s1199_s29 = smov 0  }
   0x7 LB: > { %1470 = sst [smem:[#allocation12_spill]] %s1119_s24  ;;  %s766_s30 = sadd.s32 4294967295, %s1139_s29   ;;  %s1139_s29 = sphi %s1199_s29, %s24_s29   ;;  %s1135_s28 = sphi %s1197_s28, %s1491_s28   ;;  %s1131_s27 = sphi %s1195_s27, %s1490_s27   ;;  %s1127_s26 = sphi %s1193_s26, %s1489_s26   ;;  %s1123_s25 = sphi %s1191_s25, %s1488_s25   ;;  %s1119_s24 = sphi %s1189_s24, %s1487_s24  }
   0x8   : > { %s767_s8 = sadd.s32 4294967294, %s1139_s29   ;;  %p56_p0 = scmp.ne.s32.totalorder %s1123_s25, %s1119_s24 }
   0x9   : > { %p1223_p1 = scmp.eq.s32.totalorder %s766_s30, 0  ;;  %p1227_p2 = scmp.eq.s32.totalorder %s766_s30, 1 }
   0xa   : > { %p227_p3 = scmp.eq.s32.totalorder %s767_s8, 1  ;;  %p768_p5 = scmp.ge.s32.totalorder %s1139_s29, 1 }
   0xb   : > { %s1471_s9 = scalar_select %p1223_p1, 1, 0 }
   0xc   : > { %p1233_p4 = por %p1223_p1, %p56_p0  ;;  %p1238_p6 = por %p227_p3, %p56_p0 }
   0xd   : > { %p234_p7 = scmp.lt.s32.totalorder %s1139_s29, 3  ;;  %s1141_s14 = smov [#allocation5]  }
   0xe   : > { %s1473_s11 = scalar_select %p1233_p4, 1, 0 }
   0xf   : > { %s1474_s12 = scalar_select %p1238_p6, 1, 0 }
  0x10   : > { %p1243_p8 = pnand %p768_p5, %p234_p7  ;;  %s248_s15 = sshll.u32 %s1141_s14, 4  ;;  %s1247_s15 = int_to_ptr.vmem [resolvable:$true] %s248_s15 }
  0x11   : > { %1475 = sst [smem:[#allocation13_spill]] %s1474_s12  ;;  %s1142_s17 = smov [#allocation7]  }
  0x12   : > { %p874_p9 = pneg %p1243_p8  ;;  %s270_s18 = sshll.u32 %s1142_s17, 4  ;;  %s1258_s18 = int_to_ptr.vmem [resolvable:$true] %s270_s18 }
  0x13   : > { %s967_s21 = scalar_lea.hbm %s1457_s1, 1024 }
  0x14   : > { %p1254_p11 = pnand %p874_p9, %p1223_p1  ;;  %p968_p12 = scmp.ne.s32.totalorder %s1457_s1, %s967_s21 }
  0x15   : > { %p974_p5 = scmp.lt.u32.totalorder %s967_s21, %s1457_s1 }
  0x16   : > { %p969_p13 = pneg %p1254_p11 }
  0x18   : > { %p970_p0 = pnand %p969_p13, %p968_p12 }
  0x1a   : > { %p971_p3 = pneg %p970_p0 }
  0x1c   : > { %p976_p7 = pnand %p974_p5, %p971_p3 }
  0x1e   : > { %979 = shalt.err (!%p976_p7)
}
  0x1f   : > { %s980_s14 = scalar_lea.vmem %s1247_s15, 1024  ;;  %p988_p1 = scmp.lt.s32.totalorder %s1247_s15, %s1247_s15 }
  0x20   : > { %p981_p9 = scmp.ne.s32.totalorder %s1247_s15, %s980_s14  ;;  %p989_p12 = scmp.lt.s32.totalorder %s980_s14, %s980_s14 }
  0x22   : > { %p983_p10 = pnand %p981_p9, %p969_p13  ;;  %p990_p0 = por %p989_p12, %p988_p1 }
  0x24   : > { %p984_p6 = pneg %p983_p10 }
  0x26   : > { %p991_p4 = pnand %p990_p0, %p984_p6 }
  0x28   : > { %994 = shalt.err (!%p991_p4)
}
  0x29   : > { %s1143_s17 = smov 64   ;;  %s1144_s19 = smov 4  }
  0x2a   : > { %877 = dma.hbm_to_vmem [thread:$0]  (!%p1254_p11), %s1457_s1, 1024, %s1247_s15, [#allocation6], %s1143_s17, %s1143_s17, %s1144_s19  }
  0x2b   : > { %s995_s30 = scalar_lea.hbm %s1459_s3, 1024 }
  0x2c   : > { %p996_p1 = scmp.ne.s32.totalorder %s1459_s3, %s995_s30  ;;  %p1002_p10 = scmp.lt.u32.totalorder %s995_s30, %s1459_s3 }
  0x2e   : > { %p998_p4 = pnand %p996_p1, %p969_p13 }
  0x30   : > { %p999_p6 = pneg %p998_p4 }
  0x32   : > { %p1004_p3 = pnand %p1002_p10, %p999_p6 }
  0x34   : > { %1007 = shalt.err (!%p1004_p3)
}
  0x35   : > { %s1008_s15 = scalar_lea.vmem %s1258_s18, 1024  ;;  %p1016_p12 = scmp.lt.s32.totalorder %s1258_s18, %s1258_s18 }
  0x36   : > { %p1009_p5 = scmp.ne.s32.totalorder %s1258_s18, %s1008_s15  ;;  %p1017_p0 = scmp.lt.s32.totalorder %s1008_s15, %s1008_s15 }
  0x38   : > { %p1011_p7 = pnand %p1009_p5, %p969_p13  ;;  %p1018_p1 = por %p1017_p0, %p1016_p12 }
  0x3a   : > { %p1012_p9 = pneg %p1011_p7 }
  0x3c   : > { %p1019_p4 = pnand %p1018_p1, %p1012_p9 }
  0x3e   : > { %1022 = shalt.err (!%p1019_p4)
}
  0x3f   : > { %880 = dma.hbm_to_vmem [thread:$0]  (!%p1254_p11), %s1459_s3, 1024, %s1258_s18, [#allocation6], %s1143_s17, %s1143_s17, %s1144_s19  }
  0x40   : > { %s36_s20 = sadd.s32 1, %s1135_s28  ;;  %s43_s21 = sadd.s32 1, %s1127_s26 }
  0x41   : > { %p38_p13 = scmp.ge.s32.totalorder %s36_s20, 2  ;;  %p50_p6 = scmp.ne.s32.totalorder %s1127_s26, %s1123_s25 }
  0x42   : > { %p51_p10 = scmp.eq.s32.totalorder %s1139_s29, 0  ;;  %p891_p3 = scmp.lt.s32.totalorder %s1139_s29, 2 }
  0x43   : > { %s1493_s20 = smov (%p38_p13, %s36_s20), 0  ;;  %p1322_p7 = por %p1227_p2, %p50_p6 }
  0x44   : > { %p52_p5 = por %p51_p10, %p50_p6  ;;  %s40_s22 = ssub.s32 %s1135_s28, %s1493_s20 }
  0x45   : > { %s1478_s16 = scalar_select %p1322_p7, 1, 0 }
  0x46   : > { %s293_s23 = sand.u32 1, %s1127_s26   ;;  %p41_p9 = scmp.eq.s32.totalorder %s40_s22, 0 }
  0x47   : > { %s773_s18 = sshll.u32 %s293_s23, 2  ;;  %s774_s17 = sshll.u32 %s1135_s28, 6 }
  0x48   : > { %s1331_s19 = scalar_select %p41_p9, %s1127_s26, %s43_s21  }
  0x49   : > { %s1336_s14 = scalar_lea.hbm %s1456_s0, %s774_s17  ;;  %s297_s10 = scalar_lea.vmem [#allocation2], %s773_s18 }
  0x4a   : > { %s304_s15 = sshll.u32 %s297_s10, 4  ;;  %p1340_p2 = pnand %p891_p3, %p52_p5  ;;  %s1344_s15 = int_to_ptr.vmem [resolvable:$true] %s304_s15 }
  0x4b   : > { %s294_s12 = scalar_lea.sflag [#allocation3], %s293_s23  ;;  %s1023_s21 = scalar_lea.hbm %s1336_s14, 64 }
  0x4c   : > { %p1024_p11 = scmp.ne.s32.totalorder %s1336_s14, %s1023_s21  ;;  %p1025_p12 = pneg %p1340_p2 }
  0x4d   : > { %s1028_s17 = scalar_lea.hbm %s1456_s0, 128  ;;  %p1029_p4 = scmp.lt.u32.totalorder %s1336_s14, %s1456_s0 }
  0x4e   : > { %p1026_p0 = pnand %p1025_p12, %p1024_p11  ;;  %p1030_p13 = scmp.lt.u32.totalorder %s1028_s17, %s1023_s21 }
  0x4f   : > { %p1032_p10 = scmp.lt.u32.totalorder %s1023_s21, %s1336_s14 }
  0x50   : > { %p1027_p1 = pneg %p1026_p0  ;;  %p1031_p6 = por %p1030_p13, %p1029_p4 }
  0x52   : > { %p1033_p3 = por %p1032_p10, %p1031_p6 }
  0x54   : > { %p1034_p5 = pnand %p1033_p3, %p1027_p1 }
  0x56   : > { %1037 = shalt.err (!%p1034_p5)
}
  0x57   : > { %s1038_s23 = scalar_lea.vmem %s1344_s15, 64  ;;  %s1145_s10 = smov [#allocation2]  }
  0x58   : > { %p1039_p9 = scmp.ne.s32.totalorder %s1344_s15, %s1038_s23  ;;  %s1043_s22 = sshll.u32 %s1145_s10, 4  ;;  %s1044_s22 = int_to_ptr.vmem [resolvable:$false] %s1043_s22 }
  0x59   : > { %s1045_s18 = scalar_lea.vmem %s1044_s22, 128  ;;  %p1046_p7 = scmp.lt.s32.totalorder %s1344_s15, %s1044_s22 }
  0x5a   : > { %p1041_p11 = pnand %p1039_p9, %p1025_p12  ;;  %p1047_p4 = scmp.lt.s32.totalorder %s1045_s18, %s1038_s23 }
  0x5c   : > { %p1042_p0 = pneg %p1041_p11  ;;  %p1048_p13 = por %p1047_p4, %p1046_p7 }
  0x5e   : > { %p1049_p6 = pnand %p1048_p13, %p1042_p0 }
  0x60   : > { %1052 = shalt.err (!%p1049_p6)
}
  0x61   : > { %884 = dma.hbm_to_vmem [thread:$0]  (!%p1340_p2), %s1336_s14, 64, %s1344_s15, %s294_s12  }
  0x62   : > { %313 = sbr.rel (%p1243_p8) target bundleno = 904 (0x388), region = 48  ;;  %s1374_s21 = sand.u32 (!%p1243_p8), 1, %s1123_s25  }
  0x63   : > { %s776_s17 = sshll.u32 (!%p1243_p8), %s1374_s21, 2  ;;  %s316_s30 = scalar_lea.sflag (!%p1243_p8), [#allocation3], %s1374_s21 }
  0x64   : > { %s1378_s8 = scalar_lea.vmem (!%p1243_p8), [#allocation2], %s776_s17  ;;  %p1480_p7 = scmp.ne.s32.totalorder (!%p1243_p8), %s1473_s11, 0 }
  0x69   : > { %1106 = dma.done.wait (%p1480_p7), %s316_s30, 64  }
  0x6a   : > { %1108 = vsyncadd (%p1480_p7), %s316_s30, 4294967232  ;;  %p1481_p2 = scmp.ne.s32.totalorder %s1471_s9, 0 }
  0x6c   : > { %1110 = dma.done.wait (%p1481_p2), [#allocation6], 2048  }
  0x6d   : > { %1112 = vsyncadd (%p1481_p2), [#allocation6], 4294965248  ;;  %v1146_v0 = vmov 0.0   ;;  %vm1147_vm0 = vmmov 0   ;;  %v949_v1 = vld [vmem:[#allocation5] sm:$0xff]   ;;  %v950_v2 = vld [vmem:[#allocation5 + $0x8] sm:$0xff]   ;;  %v603_v26 = vlaneseq }
  0x6e   : > { %822 = vmatprep.subr.bf16.mxu0 %v1146_v0  ;;  %838 = vmatprep.mubr.msk.bf16.mxu0 %vm1147_vm0, %v1146_v0  ;;  %v951_v3 = vld [vmem:[#allocation5 + $0x10] sm:$0xff]   ;;  %v957_v4 = vld [vmem:[#allocation7] sm:$0xff]   ;;  %v952_v5 = vld [vmem:[#allocation5 + $0x18] sm:$0xff]   ;;  %s779_s15 = sshll.u32 %s1374_s21, 3  ;;  %s801_s22 = sshll.u32 %s1131_s27, 7 }
  0x6f   : > { %842 = vmatprep.subr.bf16.mxu1 %v1146_v0  ;;  %858 = vmatprep.mubr.msk.bf16.mxu1 %vm1147_vm0, %v1146_v0  ;;  %v958_v6 = vld [vmem:[#allocation7 + $0x8] sm:$0xff]   ;;  %v953_v7 = vld [vmem:[#allocation5 + $0x20] sm:$0xff]   ;;  %v959_v8 = vld [vmem:[#allocation7 + $0x10] sm:$0xff]   ;;  %v604_v27 = vand.u32 127, %v603_v26  ;;  %s360_s18 = scalar_lea.vmem [#allocation8], %s779_s15  ;;  %s1407_s11 = scalar_lea.hbm %s1463_s7, %s801_s22 }
  0x70   : > { %823 = vmatpush3.bf16.msra.mxu0 %v949_v1  ;;  %843 = vmatpush3.bf16.msra.mxu1 %v957_v4  ;;  %v954_v9 = vld [vmem:[#allocation5 + $0x28] sm:$0xff]   ;;  %v960_v10 = vld [vmem:[#allocation7 + $0x18] sm:$0xff]   ;;  %v955_v11 = vld [vmem:[#allocation5 + $0x30] sm:$0xff]   ;;  %s653_s17 = sshll.u32 %s360_s18, 4  ;;  %p1482_p12 = scmp.ne.s32.totalorder %s1478_s16, 0  ;;  %s1409_s17 = int_to_ptr.vmem [resolvable:$true] %s653_s17 }
  0x71   : > { %824 = vmatprep.subr.bf16.mxu0 %v1146_v0  ;;  %844 = vmatprep.subr.bf16.mxu1 %v1146_v0  ;;  %v961_v12 = vld [vmem:[#allocation7 + $0x20] sm:$0xff]   ;;  %v956_v13 = vld [vmem:[#allocation5 + $0x38] sm:$0xff]   ;;  %v962_v14 = vld [vmem:[#allocation7 + $0x28] sm:$0xff]   ;;  %vm605_vm1 = vcmp.lt.s32.totalorder %v604_v27, 32  ;;  %s1053_s13 = scalar_lea.vmem %s1409_s17, 128  ;;  %s1148_s27 = smov [#allocation8]  }
  0x72   : > { %v378_v15 = vld [vmem:[%s1378_s8] sm:$0xf]  ;;  %v963_v16 = vld [vmem:[#allocation7 + $0x30] sm:$0xff]   ;;  %p1054_p8 = scmp.ne.s32.totalorder %s1409_s17, %s1053_s13  ;;  %s1057_s14 = sshll.u32 %s1148_s27, 4  ;;  %s1058_s14 = int_to_ptr.vmem [resolvable:$false] %s1057_s14 }
  0x73   : > { %v964_v17 = vld [vmem:[#allocation7 + $0x38] sm:$0xff]   ;;  %s1059_s15 = scalar_lea.vmem %s1058_s14, 256  ;;  %p1060_p3 = scmp.lt.s32.totalorder %s1409_s17, %s1058_s14 }
  0x74   : > { %825 = vmatpush3.bf16.msra.mxu0 %v950_v2  ;;  %845 = vmatpush3.bf16.msra.mxu1 %v958_v6  ;;  %v781_v18 = vld [vmem:[%s1458_s2] ss:$0 sm:$0xff]  ;;  %p1055_p1 = pnand %p1054_p8, %p1482_p12  ;;  %p1061_p5 = scmp.lt.s32.totalorder %s1059_s15, %s1053_s13 }
  0x75   : > { %826 = vmatprep.subr.bf16.mxu0 %v1146_v0  ;;  %846 = vmatprep.subr.bf16.mxu1 %v1146_v0  ;;  %v780_v28 = vld [vmem:[%s1460_s4] ss:$0 sm:$0xff] }
  0x76   : > { %v798_v44 = vld [vmem:[%s1461_s5] ss:$0 sm:$0xff]  ;;  %p1056_p10 = pneg %p1055_p1  ;;  %p1062_p9 = por %p1061_p5, %p1060_p3 }
  0x77   : > { %v635_v45 = vld [vmem:[%s1378_s8] sm:$0xf]  ;;  %s640_s8 = scalar_lea.sflag [#allocation4], %s1374_s21 }
  0x78   : > { %827 = vmatpush3.bf16.msra.mxu0 %v951_v3  ;;  %847 = vmatpush3.bf16.msra.mxu1 %v959_v8  ;;  %v799_v47 = vld [vmem:[%s1462_s6] ss:$0 sm:$0xff]  ;;  %v636_v48 = vunpack.c.l.bf16 %v635_v45  ;;  %p1063_p11 = pnand %p1062_p9, %p1056_p10 }
  0x79   : > { %828 = vmatprep.subr.bf16.mxu0 %v1146_v0  ;;  %848 = vmatprep.subr.bf16.mxu1 %v1146_v0 }
  0x7c   : > { %829 = vmatpush3.bf16.msra.mxu0 %v952_v5  ;;  %849 = vmatpush3.bf16.msra.mxu1 %v960_v10 }
  0x7d   : > { %830 = vmatprep.subr.bf16.mxu0 %v1146_v0  ;;  %850 = vmatprep.subr.bf16.mxu1 %v1146_v0 }
  0x80   : > { %831 = vmatpush3.bf16.msra.mxu0 %v953_v7  ;;  %851 = vmatpush3.bf16.msra.mxu1 %v961_v12 }
  0x81   : > { %832 = vmatprep.subr.bf16.mxu0 %v1146_v0  ;;  %852 = vmatprep.subr.bf16.mxu1 %v1146_v0 }
  0x84   : > { %833 = vmatpush3.bf16.msra.mxu0 %v954_v9  ;;  %853 = vmatpush3.bf16.msra.mxu1 %v962_v14 }
  0x85   : > { %834 = vmatprep.subr.bf16.mxu0 %v1146_v0  ;;  %854 = vmatprep.subr.bf16.mxu1 %v1146_v0 }
  0x88   : > { %835 = vmatpush3.bf16.msra.mxu0 %v955_v11  ;;  %855 = vmatpush3.bf16.msra.mxu1 %v963_v16 }
  0x89   : > { %836 = vmatprep.subr.bf16.mxu0 %v1146_v0  ;;  %856 = vmatprep.subr.bf16.mxu1 %v1146_v0 }
  0x8c   : > { %837 = vmatpush3.bf16.msra.mxu0 %v956_v13  ;;  %857 = vmatpush3.bf16.msra.mxu1 %v964_v17 }
  0x8f   : > { %839 = vmatmul.mubr.bf16.vlgmr.msra.gmra.mrb[0].mxu0 %v378_v15 }
 0x162   : > { %v484_v19 = vpop.f32.mrb[0].mxu0 }
 0x163   : > { %v485_v20 = vadd.f32 %v781_v18, %v484_v19  ;;  %v840_v21 = vpop.f32.mrb[1].mxu0 }
 0x164   : > { %v487_v22 = vpop.f32.mrb[2].mxu0 }
 0x165   : > { %v490_v23 = vmax.f32 %v485_v20, 0.0  ;;  %v841_v24 = vpop.f32.mrb[3].mxu0 }
 0x167   : > { %v492_v25 = vpack.c.bf16 %v490_v23, %v490_v23 }
 0x169   : > { %859 = vmatmul.mubr.bf16.vlgmr.msra.gmra.mrb[0].mxu1 %v492_v25 }
 0x23c   : > { %v591_v29 = vpop.f32.mrb[0].mxu1 }
 0x23d   : > { %v597_v30 = vadd.f32 %v780_v28, %v591_v29  ;;  %v860_v31 = vpop.f32.mrb[1].mxu1 }
 0x23e   : > { %v594_v32 = vpop.f32.mrb[2].mxu1 }
 0x23f   : > { %v861_v33 = vpop.f32.mrb[3].mxu1  ;;  %v606_v34 = vsel %vm605_vm1, %v597_v30, 0.0 }
 0x240   : > { %607 = vadd.xlane.f32.xlu0 %v606_v34 }
 0x2cd   : > { %v608_v35 = vpop.xlane.xlu0 %607 }
 0x2ce   : > { %v609_v36 = vmul.f32 0.03125, %v608_v35 }
 0x2d0   : > { %v610_v37 = vsub.f32 %v606_v34, %v609_v36 }
 0x2d2   : > { %v611_v38 = vsel %vm605_vm1, %v610_v37, 0.0 }
 0x2d3   : > { %v612_v39 = vmul.f32 %v611_v38, %v611_v38 }
 0x2d5   : > { %613 = vadd.xlane.f32.xlu0 %v612_v39 }
 0x362   : > { %v614_v40 = vpop.xlane.xlu0 %613 }
 0x363   : > { %v615_v41 = vmul.f32 0.03125, %v614_v40 }
 0x365   : > { %v616_v42 = vadd.f32 1e-05, %v615_v41 }
 0x367   : > { %965 = vrsqrt.f32 %v616_v42 }
 0x371   : > { %v966_v43 = vpop.eup %965 }
 0x372   : > { %v618_v46 = vmul.f32 %v966_v43, %v611_v38 }
 0x374   : > { %v626_v49 = vmul.f32 %v798_v44, %v618_v46 }
 0x376   : > { %v634_v50 = vadd.f32 %v799_v47, %v626_v49 }
 0x378   : > { %v637_v51 = vadd.f32 %v636_v48, %v634_v50 }
 0x37a   : > { %638 = vst [vmem:[%s360_s18] sm:$0xff] %v637_v51 }
 0x37b   : > { %1066 = shalt.err (!%p1063_p11)
}
 0x37c   : > { %s1067_s21 = scalar_lea.hbm %s1407_s11, 128  ;;  %s1071_s23 = scalar_lea.hbm %s1463_s7, 256 }
 0x37d   : > { %p1068_p0 = scmp.ne.s32.totalorder %s1407_s11, %s1067_s21  ;;  %p1072_p6 = scmp.lt.u32.totalorder %s1407_s11, %s1463_s7 }
 0x37e   : > { %p1073_p7 = scmp.lt.u32.totalorder %s1071_s23, %s1067_s21  ;;  %p1075_p8 = scmp.lt.u32.totalorder %s1067_s21, %s1407_s11 }
 0x37f   : > { %p1069_p4 = pnand %p1068_p0, %p1482_p12 }
 0x380   : > { %p1074_p2 = por %p1073_p7, %p1072_p6 }
 0x381   : > { %p1070_p13 = pneg %p1069_p4 }
 0x382   : > { %p1076_p1 = por %p1075_p8, %p1074_p2 }
 0x384   : > { %p1077_p10 = pnand %p1076_p1, %p1070_p13 }
 0x386   : > { %1080 = shalt.err (!%p1077_p10)
}
 0x387   : > { %872 = dma.vmem_to_hbm [thread:$0]  (%p1482_p12), %s1409_s17, 128, %s1407_s11, %s640_s8  }
 0x388 PF: > { %s1483_s18 = sld [smem:[#allocation12_spill]]  ;;  %s1484_s30 = sld [smem:[#allocation13_spill]] }
 0x389   : > { %p1486_p5 = scmp.ge.s32.totalorder %s1139_s29, 2 }
 0x38e   : > { %s665_s9 = sand.u32 1, %s1483_s18   ;;  %p1485_p3 = scmp.ne.s32.totalorder %s1484_s30, 0 }
 0x38f   : > { %s666_s13 = scalar_lea.sflag [#allocation4], %s665_s9 }
 0x390   : > { %p886_p9 = pnand %p1486_p5, %p1485_p3 }
 0x392   : > { %1114 = dma.done.wait (!%p886_p9), %s666_s13, 128  }
 0x393   : > { %1116 = vsyncadd (!%p886_p9), %s666_s13, 4294967168  ;;  %s24_s29 = sadd.s32 1, %s1139_s29   ;;  %s1487_s24 = smov %s1123_s25 }
 0x394   : > { %p21_p11 = scmp.ge.s32.totalorder %s24_s29, 4   ;;  %s1488_s25 = smov %s1127_s26 }
 0x395   : > { %s1489_s26 = smov %s1331_s19  ;;  %s1490_s27 = smov %s1135_s28 }
 0x396   : > { %s1491_s28 = smov %s1493_s20  ;;  %23 = sbr.rel (!%p21_p11) target bundleno = 7 (0x7), region = 114 }
 0x39d   :  { %671 = vsyncpa [#allocation3], 1 }
 0x39e   :  { %673 = vsyncpa [#allocation3 + $0x1], 1 }
 0x39f   :  { %674 = vsyncpa [#allocation6], 1 }
 0x3a0   :  { %675 = vsyncpa [#allocation4], 1 }
 0x3a1   :  { %677 = vsyncpa [#allocation4 + $0x1], 1 }

</bundles_post_ra>
